<compile_context>
chip_gen: v7x
topology: tpu7x:2x2x1
jax: 0.10.0
libtpu: 0.0.40
codegen_flags: <defaults>
</compile_context>

<pallas_src>
import functools

import jax
import jax.numpy as jnp
from jax.experimental import pallas as pl
from jax.experimental.pallas import tpu as pltpu

BN_EPS = 1e-5


def _round_up(v, m):
    return ((v + m - 1) // m) * m


def _round_down(v, m):
    return max(m, (v // m) * m)


# --------------------------------------------------------------------------
# Kernel: grid = (F_pad//tn, Din_pad//tk); full (padded) batch in every block.
# Output-stationary K accumulation into a f32 VMEM scratch; bias + ReLU +
# BatchNorm (training-mode batch statistics) fused into the last-k epilogue.
# --------------------------------------------------------------------------
def _lazy_linear_block_kernel(x_ref, w_ref, bgb_ref, o_ref, acc_ref, *,
                              batch_true, batch_pad, tk, n_k, x_resident):
    k = pl.program_id(1)

    @pl.when(k == 0)
    def _():
        acc_ref[...] = jnp.zeros_like(acc_ref)

    if x_resident and n_k > 1:
        off = pl.multiple_of(k * tk, 128)
        x_blk = x_ref[:, pl.ds(off, tk)]
    else:
        x_blk = x_ref[...]

    # MXU partial product, f32 accumulate in VMEM scratch.
    acc_ref[...] += jnp.dot(x_blk, w_ref[...],
                            preferred_element_type=jnp.float32)

    @pl.when(k == n_k - 1)
    def _():
        bias = bgb_ref[0:1, :]
        gamma = bgb_ref[1:2, :]
        beta = bgb_ref[2:3, :]

        # Bias + ReLU.
        a = jnp.maximum(acc_ref[...] + bias, 0.0)

        # BatchNorm1d training-mode biased batch stats over the TRUE batch
        # rows (padded rows masked out).  Two-pass variance for accuracy.
        inv_n = jnp.float32(1.0 / batch_true)
        if batch_true == batch_pad:
            mean = jnp.sum(a, axis=0, keepdims=True) * inv_n
            diff = a - mean
        else:
            rows = jax.lax.broadcasted_iota(jnp.int32, a.shape, 0)
            valid = (rows < batch_true).astype(jnp.float32)
            mean = jnp.sum(a * valid, axis=0, keepdims=True) * inv_n
            diff = (a - mean) * valid
        var = jnp.sum(diff * diff, axis=0, keepdims=True) * inv_n
        inv_std = jax.lax.rsqrt(var + BN_EPS)          # EUP slot

        # Fused affine: out = a * scale + shift.
        scale = gamma * inv_std
        shift = beta - mean * scale
        o_ref[...] = (a * scale + shift).astype(o_ref.dtype)


# --------------------------------------------------------------------------
# Tile / VMEM planning (generation-aware via physical VMEM capacity).
# --------------------------------------------------------------------------
def _plan(batch, din, f, compute_dtype):
    b_pad = _round_up(max(batch, 8), 8)
    bpe = jnp.dtype(compute_dtype).itemsize

    try:
        vmem_cap = pltpu.get_tpu_info().vmem_capacity_bytes
    except Exception:  # query unavailable -> conservative default
        vmem_cap = 64 << 20
    # Scoped budget: half of physical VMEM (v5e/v6e -> 64 MiB, v7x -> 32 MiB).
    budget = min(vmem_cap // 2, 64 << 20)

    def x_res(din_pad):
        return 2 * b_pad * din_pad * bpe <= min(budget // 4, 8 << 20)

    def est(tk, tn, din_pad, w_nbuf):
        x_cols = din_pad if x_res(din_pad) else tk
        return (2 * b_pad * x_cols * bpe        # x (worst-case double buffer)
                + w_nbuf * tk * tn * bpe        # W tiles
                + 2 * 8 * tn * 4                # packed b/gamma/beta (8-row pad)
                + 2 * b_pad * tn * 4            # out double buffer
                + b_pad * tn * 4)               # f32 accumulator scratch

    # N (feature) tile: lane-dense, up to 1024.
    f_128 = _round_up(f, 128)
    tn = min(f_128, 1024)
    f_pad = _round_up(f, tn)
    # Keep >=2 blocks on the parallel F axis when possible (v7x megacore).
    if f_pad // tn < 2 and f_pad >= 256 and f_pad % 256 == 0:
        tn = f_pad // 2

    # K (reduction) tile: collapse the K grid when Din is small enough.
    din_128 = _round_up(din, 128)
    tk = din_128 if din_128 <= 2048 else 1024
    din_pad = _round_up(din, tk)

    # Shrink tk, then tn, until the double-buffered working set fits.
    while est(tk, tn, din_pad, 2) > budget and tk > 128:
        tk = _round_down(tk // 2, 128)
        din_pad = _round_up(din, tk)
    while est(tk, tn, din_pad, 2) > budget and tn > 128:
        tn = _round_down(tn // 2, 128)
        f_pad = _round_up(f, tn)

    if est(tk, tn, din_pad, 2) > budget:
        # TODO(synk): for training-size batches, split into a batch-tiled
        # matmul+bias+ReLU kernel plus a separate two-pass BN-stats kernel.
        raise ValueError(
            "Batch too large for the full-batch-in-VMEM BatchNorm design: "
            f"needs ~{est(tk, tn, din_pad, 2) >> 20} MiB VMEM, budget "
            f"{budget >> 20} MiB.")

    n_k = din_pad // tk
    # Triple-buffer the W stream on long K loops when VMEM headroom allows.
    w_nbuf = 3 if (n_k >= 3 and est(tk, tn, din_pad, 3) <= budget) else 2

    return dict(b_pad=b_pad, din_pad=din_pad, f_pad=f_pad, tk=tk, tn=tn,
                n_k=n_k, n_j=f_pad // tn, x_resident=x_res(din_pad),
                w_nbuf=w_nbuf, vmem_limit=int(budget), bpe=bpe)


# --------------------------------------------------------------------------
# Parameter preparation (hoisted out of the per-call path).
# --------------------------------------------------------------------------
def prepare_lazy_linear_block_params(w, b, gamma, beta, *, batch,
                                     compute_dtype=jnp.float32):
    """Pad + cast W once and pack bias/gamma/beta into one (3, F_pad) operand."""
    din, f = w.shape
    plan = _plan(batch, din, f, compute_dtype)
    din_pad, f_pad = plan["din_pad"], plan["f_pad"]

    w_p = jnp.zeros((din_pad, f_pad), compute_dtype)
    w_p = w_p.at[:din, :f].set(w.astype(compute_dtype))

    bgb = jnp.zeros((3, f_pad), jnp.float32)
    bgb = bgb.at[0, :f].set(b.astype(jnp.float32))
    bgb = bgb.at[1, :f].set(gamma.astype(jnp.float32))
    bgb = bgb.at[2, :f].set(beta.astype(jnp.float32))

    return dict(w=w_p, bgb=bgb, din=din, f=f, batch=batch,
                compute_dtype=jnp.dtype(compute_dtype), plan=plan)


def lazy_linear_block_apply(x_nchw, params):
    """x_nchw: (B, C, H, W). Returns (B, F) float32."""
    plan = params["plan"]
    bsz = x_nchw.shape[0]
    assert bsz == params["batch"], "params were prepared for a different batch"
    din, f = params["din"], params["f"]
    b_pad, din_pad, f_pad = plan["b_pad"], plan["din_pad"], plan["f_pad"]
    tk, tn, n_k, n_j = plan["tk"], plan["tn"], plan["n_k"], plan["n_j"]
    cdt = params["compute_dtype"]
    bpe = plan["bpe"]

    x_flat = x_nchw.reshape(bsz, -1)
    assert x_flat.shape[1] == din

    if (bsz, din) == (b_pad, din_pad) and x_flat.dtype == cdt:
        x_p = x_flat                                   # already aligned: no copy
    else:
        x_p = jnp.zeros((b_pad, din_pad), cdt).at[:bsz, :din].set(
            x_flat.astype(cdt))

    kernel = functools.partial(
        _lazy_linear_block_kernel, batch_true=bsz, batch_pad=b_pad,
        tk=tk, n_k=n_k, x_resident=plan["x_resident"])

    if plan["x_resident"]:
        x_spec = pl.BlockSpec((b_pad, din_pad), lambda j, k: (0, 0))
    else:
        x_spec = pl.BlockSpec((b_pad, tk), lambda j, k: (0, k))

    if plan["w_nbuf"] > 2:
        w_spec = pl.BlockSpec((tk, tn), lambda j, k: (k, j),
                              pipeline_mode=pl.Buffered(plan["w_nbuf"]))
    else:
        w_spec = pl.BlockSpec((tk, tn), lambda j, k: (k, j))

    out_pad = pl.pallas_call(
        kernel,
        out_shape=jax.ShapeDtypeStruct((b_pad, f_pad), jnp.float32),
        grid_spec=pltpu.PrefetchScalarGridSpec(
            num_scalar_prefetch=0,
            grid=(n_j, n_k),
            in_specs=[
                x_spec,                                      # x
                w_spec,                                      # W
                pl.BlockSpec((3, tn), lambda j, k: (0, j)),  # bias/gamma/beta
            ],
            out_specs=pl.BlockSpec((b_pad, tn), lambda j, k: (0, j)),
            scratch_shapes=[pltpu.VMEM((b_pad, tn), jnp.float32)],
        ),
        compiler_params=pltpu.CompilerParams(
            dimension_semantics=("parallel", "arbitrary"),
            vmem_limit_bytes=plan["vmem_limit"],
        ),
        cost_estimate=pl.CostEstimate(
            flops=2 * b_pad * din_pad * f_pad,
            transcendentals=f_pad,
            bytes_accessed=(b_pad * din_pad * bpe + din_pad * f_pad * bpe
                            + 3 * f_pad * 4 + b_pad * f_pad * 4),
        ),
    )(x_p, params["w"], params["bgb"])

    return out_pad[:bsz, :f]


def lazy_linear_block(x_nchw, w, b, gamma, beta, *, compute_dtype=jnp.float32):
    """One-shot convenience wrapper (prepares params every call)."""
    params = prepare_lazy_linear_block_params(
        w, b, gamma, beta, batch=x_nchw.shape[0], compute_dtype=compute_dtype)
    return lazy_linear_block_apply(x_nchw, params)


# --------------------------------------------------------------------------
# Pure-JAX reference (flatten -> Linear -> ReLU -> BatchNorm1d batch stats).
# --------------------------------------------------------------------------
def reference(x_nchw, w, b, gamma, beta, *, compute_dtype=jnp.float32):
    bsz = x_nchw.shape[0]
    xf = x_nchw.reshape(bsz, -1).astype(jnp.float32)
    z = jnp.dot(xf.astype(compute_dtype), w.astype(compute_dtype),
                preferred_element_type=jnp.float32) + b
    a = jnp.maximum(z, 0.0)
    mean = a.mean(axis=0, keepdims=True)
    var = ((a - mean) ** 2).mean(axis=0, keepdims=True)
    return (a - mean) / jnp.sqrt(var + BN_EPS) * gamma + beta


if __name__ == "__main__":
    key = jax.random.PRNGKey(0)
    B, C, H, W = 2, 4, 16, 16
    F = 32
    Din = C * H * W

    k_x, k_w, k_b = jax.random.split(key, 3)
    x = jax.random.normal(k_x, (B, C, H, W), dtype=jnp.float32)
    bound = 1.0 / (Din ** 0.5)
    w = jax.random.uniform(k_w, (Din, F), minval=-bound, maxval=bound,
                           dtype=jnp.float32)
    b = jax.random.uniform(k_b, (F,), minval=-bound, maxval=bound,
                           dtype=jnp.float32)
    gamma = jnp.ones((F,), jnp.float32)     # BatchNorm1d default affine init
    beta = jnp.zeros((F,), jnp.float32)

    # f32 path (default, torch-parity numerics).
    params_f32 = prepare_lazy_linear_block_params(w, b, gamma, beta, batch=B)
    out = jax.block_until_ready(lazy_linear_block_apply(x, params_f32))
    ref = reference(x, w, b, gamma, beta)
    assert out.shape == (B, F)
    assert jnp.allclose(out, ref, atol=1e-4, rtol=1e-4), "f32 mismatch vs ref"

    # bf16 MXU-input path (halves weight HBM bytes), checked against a
    # bf16-input / f32-accumulate reference.
    params_bf16 = prepare_lazy_linear_block_params(
        w, b, gamma, beta, batch=B, compute_dtype=jnp.bfloat16)
    out_bf16 = jax.block_until_ready(lazy_linear_block_apply(x, params_bf16))
    ref_bf16 = reference(x, w, b, gamma, beta, compute_dtype=jnp.bfloat16)
    assert jnp.allclose(out_bf16, ref_bf16, atol=5e-3, rtol=5e-3), \
        "bf16 mismatch vs bf16 reference"

    # TODO(synk): dropout / residual branches are disabled by the module's
    # defaults (dropout=None, residual=False) and are not emitted here.
    print("KERNEL_OK")
</pallas_src>

<mosaic_0001>
module attributes {stable_mosaic.version = 11 : i64} {
  func.func @_lazy_linear_block_kernel(%arg0: i32, %arg1: i32, %arg2: memref<8x1024xf32, #tpu.memory_space<vmem>>, %arg3: memref<1024x128xf32, #tpu.memory_space<vmem>>, %arg4: memref<3x128xf32, #tpu.memory_space<vmem>>, %arg5: memref<8x128xf32, #tpu.memory_space<vmem>>, %arg6: memref<8x128xf32, #tpu.memory_space<vmem>>) attributes {dimension_semantics = [#tpu.dimension_semantics<parallel>, #tpu.dimension_semantics<arbitrary>], iteration_bounds = array<i64: 1, 1>, scalar_prefetch = 0 : i64, scratch_operands = 1 : i64, tpu.core_type = #tpu.core_type<tc>, window_params = [{pipeline_mode = #tpu.pipeline_mode<synchronous>, transform_indices = @transform_0, window_bounds = array<i64: 8, 1024>}, {transform_indices = @transform_1, window_bounds = array<i64: 1024, 128>}, {transform_indices = @transform_2, window_bounds = array<i64: 3, 128>}, {transform_indices = @transform_3, window_bounds = array<i64: 8, 128>}]} {
    %c0_i32 = arith.constant 0 : i32
    %0 = arith.cmpi eq, %arg1, %c0_i32 : i32
    %1 = arith.extui %0 : i1 to i32
    %c0_i32_0 = arith.constant 0 : i32
    %2 = arith.cmpi ne, %1, %c0_i32_0 : i32
    scf.if %2 {
      %cst_10 = arith.constant 0.000000e+00 : f32
      %12 = vector.broadcast %cst_10 : f32 to vector<8x128xf32>
      %c0_11 = arith.constant 0 : index
      %c0_12 = arith.constant 0 : index
      %13 = vector.load %arg6[%c0_11, %c0_12] : memref<8x128xf32, #tpu.memory_space<vmem>>, vector<8x128xf32>
      tpu.vector_store %arg6[%c0_11, %c0_12], %12 {strides = array<i32>} : memref<8x128xf32, #tpu.memory_space<vmem>>, vector<8x128xf32>,
    } else {
    }
    %c0 = arith.constant 0 : index
    %c0_1 = arith.constant 0 : index
    %3 = vector.load %arg2[%c0, %c0_1] : memref<8x1024xf32, #tpu.memory_space<vmem>>, vector<8x1024xf32>
    %c0_2 = arith.constant 0 : index
    %c0_3 = arith.constant 0 : index
    %4 = vector.load %arg6[%c0_2, %c0_3] : memref<8x128xf32, #tpu.memory_space<vmem>>, vector<8x128xf32>
    %c0_4 = arith.constant 0 : index
    %c0_5 = arith.constant 0 : index
    %5 = vector.load %arg3[%c0_4, %c0_5] : memref<1024x128xf32, #tpu.memory_space<vmem>>, vector<1024x128xf32>
    %cst = arith.constant dense<0.000000e+00> : vector<8x128xf32>
    %6 = tpu.matmul %3, %5, %cst {dimension_numbers = #tpu.dot_dimension_numbers<[1], [0], [0], [1], [0, 0, 1, 1], [], []>} : vector<8x1024xf32>, vector<1024x128xf32>, vector<8x128xf32> -> vector<8x128xf32>
    %7 = arith.addf %4, %6 : vector<8x128xf32>
    %c0_6 = arith.constant 0 : index
    %c0_7 = arith.constant 0 : index
    %8 = vector.load %arg6[%c0_6, %c0_7] : memref<8x128xf32, #tpu.memory_space<vmem>>, vector<8x128xf32>
    tpu.vector_store %arg6[%c0_6, %c0_7], %7 {strides = array<i32>} : memref<8x128xf32, #tpu.memory_space<vmem>>, vector<8x128xf32>,
    %c0_i32_8 = arith.constant 0 : i32
    %9 = arith.cmpi eq, %arg1, %c0_i32_8 : i32
    %10 = arith.extui %9 : i1 to i32
    %c0_i32_9 = arith.constant 0 : i32
    %11 = arith.cmpi ne, %10, %c0_i32_9 : i32
    scf.if %11 {
      %c0_10 = arith.constant 0 : index
      %c0_11 = arith.constant 0 : index
      %12 = vector.load %arg4[%c0_10, %c0_11] : memref<3x128xf32, #tpu.memory_space<vmem>>, vector<1x128xf32>
      %c1 = arith.constant 1 : index
      %c0_12 = arith.constant 0 : index
      %13 = vector.load %arg4[%c1, %c0_12] : memref<3x128xf32, #tpu.memory_space<vmem>>, vector<1x128xf32>
      %c2 = arith.constant 2 : index
      %c0_13 = arith.constant 0 : index
      %14 = vector.load %arg4[%c2, %c0_13] : memref<3x128xf32, #tpu.memory_space<vmem>>, vector<1x128xf32>
      %c0_14 = arith.constant 0 : index
      %c0_15 = arith.constant 0 : index
      %15 = vector.load %arg6[%c0_14, %c0_15] : memref<8x128xf32, #tpu.memory_space<vmem>>, vector<8x128xf32>
      %16 = vector.broadcast %12 : vector<1x128xf32> to vector<8x128xf32>
      %17 = arith.addf %15, %16 : vector<8x128xf32>
      %cst_16 = arith.constant 0.000000e+00 : f32
      %18 = vector.broadcast %cst_16 : f32 to vector<8x128xf32>
      %19 = arith.maximumf %17, %18 : vector<8x128xf32>
      %20 = tpu.iota {dimensions = array<i32: 0>} : vector<8x128xi32>
      %c2_i32 = arith.constant 2 : i32
      %21 = vector.broadcast %c2_i32 : i32 to vector<8x128xi32>
      %22 = arith.cmpi slt, %20, %21 : vector<8x128xi32>
      %23 = arith.extui %22 : vector<8x128xi1> to vector<8x128xi32>
      %24 = arith.sitofp %23 : vector<8x128xi32> to vector<8x128xf32>
      %25 = arith.mulf %19, %24 : vector<8x128xf32>
      %cst_17 = arith.constant dense<0.000000e+00> : vector<128xf32>
      %26 = vector.multi_reduction <add>, %25, %cst_17 [0] : vector<8x128xf32> to vector<128xf32>
      %27 = vector.shape_cast %26 : vector<128xf32> to vector<1x128xf32>
      %cst_18 = arith.constant 5.000000e-01 : f32
      %28 = vector.broadcast %cst_18 : f32 to vector<1x128xf32>
      %29 = arith.mulf %27, %28 : vector<1x128xf32>
      %30 = vector.broadcast %29 : vector<1x128xf32> to vector<8x128xf32>
      %31 = arith.subf %19, %30 : vector<8x128xf32>
      %32 = arith.mulf %31, %24 : vector<8x128xf32>
      %33 = arith.mulf %32, %32 : vector<8x128xf32>
      %cst_19 = arith.constant dense<0.000000e+00> : vector<128xf32>
      %34 = vector.multi_reduction <add>, %33, %cst_19 [0] : vector<8x128xf32> to vector<128xf32>
      %35 = vector.shape_cast %34 : vector<128xf32> to vector<1x128xf32>
      %cst_20 = arith.constant 5.000000e-01 : f32
      %36 = vector.broadcast %cst_20 : f32 to vector<1x128xf32>
      %37 = arith.mulf %35, %36 : vector<1x128xf32>
      %cst_21 = arith.constant 9.99999974E-6 : f32
      %38 = vector.broadcast %cst_21 : f32 to vector<1x128xf32>
      %39 = arith.addf %37, %38 : vector<1x128xf32>
      %40 = math.rsqrt %39 : vector<1x128xf32>
      %41 = arith.mulf %13, %40 : vector<1x128xf32>
      %42 = arith.mulf %29, %41 : vector<1x128xf32>
      %43 = arith.subf %14, %42 : vector<1x128xf32>
      %44 = vector.broadcast %41 : vector<1x128xf32> to vector<8x128xf32>
      %45 = arith.mulf %19, %44 : vector<8x128xf32>
      %46 = vector.broadcast %43 : vector<1x128xf32> to vector<8x128xf32>
      %47 = arith.addf %45, %46 : vector<8x128xf32>
      %c0_22 = arith.constant 0 : index
      %c0_23 = arith.constant 0 : index
      %48 = vector.load %arg5[%c0_22, %c0_23] : memref<8x128xf32, #tpu.memory_space<vmem>>, vector<8x128xf32>
      tpu.vector_store %arg5[%c0_22, %c0_23], %47 {strides = array<i32>} : memref<8x128xf32, #tpu.memory_space<vmem>>, vector<8x128xf32>,
    } else {
    }
    return
  }
  func.func @transform_0(%arg0: i32, %arg1: i32) -> (i32, i32) {
    %c0_i32 = arith.constant 0 : i32
    %c0_i32_0 = arith.constant 0 : i32
    %c0_i32_1 = arith.constant 0 : i32
    return %c0_i32, %c0_i32_0 : i32, i32
  }
  func.func @transform_1(%arg0: i32, %arg1: i32) -> (i32, i32) {
    %c0_i32 = arith.constant 0 : i32
    return %arg1, %arg0 : i32, i32
  }
  func.func @transform_2(%arg0: i32, %arg1: i32) -> (i32, i32) {
    %c0_i32 = arith.constant 0 : i32
    %c0_i32_0 = arith.constant 0 : i32
    return %c0_i32, %arg0 : i32, i32
  }
  func.func @transform_3(%arg0: i32, %arg1: i32) -> (i32, i32) {
    %c0_i32 = arith.constant 0 : i32
    %c0_i32_0 = arith.constant 0 : i32
    return %c0_i32, %arg0 : i32, i32
  }
}

</mosaic_0001>

<bundles_post_ra>
// kernel: tpu_custom_call.1
= control target key start
LH: loop header
LB: loop body
LE: loop exit
PB: predicated region body
PF: predicated region fallthrough
CT: control target
= control target key end

     0   :  { %8 = vsyncpa [#allocation4], 0  ;;  %s961_s0 = inlined_call_operand.hbm [shape: f32[8,1024], index: 0, kind: input, shape index: {}]   ;;  %s962_s1 = inlined_call_operand.hbm [shape: f32[1024,128], index: 1, kind: input, shape index: {}]   ;;  %s963_s2 = inlined_call_operand.vmem [shape: f32[3,128], index: 2, kind: input, shape index: {}]   ;;  %s964_s3 = inlined_call_operand.hbm [shape: f32[8,128], index: 3, kind: output, shape index: {}]  }
   0x1   :  { %9 = vsyncpa [#allocation7], 0 }
   0x2   :  { %10 = vsyncpa [#allocation5], 0  ;;  %s883_s12 = smov [#allocation3]   ;;  %s884_s14 = smov [#allocation6]  }
   0x3   :  { %s17_s13 = sshll.u32 %s883_s12, 4  ;;  %s26_s15 = sshll.u32 %s884_s14, 4  ;;  %s18_s13 = int_to_ptr.vmem [resolvable:$true] %s17_s13  ;;  %s909_s15 = int_to_ptr.vmem [resolvable:$true] %s26_s15 }
   0x4   :  { %s811_s18 = scalar_lea.hbm %s961_s0, 1024 }
   0x5   :  { %p812_p0 = scmp.ne.s32.totalorder %s961_s0, %s811_s18  ;;  %p815_p1 = scmp.lt.u32.totalorder %s811_s18, %s961_s0 }
   0x7   :  { %p817_p2 = pnand %p815_p1, %p812_p0 }
   0x9   :  { %820 = shalt.err (!%p817_p2)
}
   0xa   :  { %s821_s23 = scalar_lea.vmem %s18_s13, 1024  ;;  %p826_p4 = scmp.lt.s32.totalorder %s18_s13, %s18_s13 }
   0xb   :  { %p822_p3 = scmp.ne.s32.totalorder %s18_s13, %s821_s23  ;;  %p827_p5 = scmp.lt.s32.totalorder %s821_s23, %s821_s23 }
   0xd   :  { %p828_p6 = por %p827_p5, %p826_p4 }
   0xf   :  { %p829_p7 = pnand %p828_p6, %p822_p3 }
  0x11   :  { %832 = shalt.err (!%p829_p7)
}
  0x12   :  { %20 = dma.hbm_to_vmem [thread:$0]  %s961_s0, 1024, %s18_s13, [#allocation4]  }
  0x13   :  { %s833_s28 = scalar_lea.hbm %s962_s1, 16384 }
  0x14   :  { %p834_p8 = scmp.ne.s32.totalorder %s962_s1, %s833_s28  ;;  %p837_p9 = scmp.lt.u32.totalorder %s833_s28, %s962_s1 }
  0x16   :  { %p839_p10 = pnand %p837_p9, %p834_p8 }
  0x18   :  { %842 = shalt.err (!%p839_p10)
}
  0x19   :  { %s843_s6 = scalar_lea.vmem %s909_s15, 16384  ;;  %p848_p12 = scmp.lt.s32.totalorder %s909_s15, %s909_s15 }
  0x1a   :  { %p844_p11 = scmp.ne.s32.totalorder %s909_s15, %s843_s6  ;;  %p849_p13 = scmp.lt.s32.totalorder %s843_s6, %s843_s6 }
  0x1c   :  { %p850_p0 = por %p849_p13, %p848_p12 }
  0x1e   :  { %p851_p1 = pnand %p850_p0, %p844_p11 }
  0x20   :  { %854 = shalt.err (!%p851_p1)
}
  0x21   :  { %s885_s0 = smov 128   ;;  %s886_s7 = smov 8  }
  0x22   :  { %32 = dma.hbm_to_vmem [thread:$0]  %s962_s1, 16384, %s909_s15, [#allocation7], %s885_s0, %s885_s0, %s886_s7  }
  0x23   :  { %877 = dma.done.wait [#allocation4], 1024  }
  0x24   :  { %878 = vsyncadd [#allocation4], 4294966272 }
  0x25   :  { %879 = dma.done.wait [#allocation7], 16384  }
  0x26   :  { %880 = vsyncadd [#allocation7], 4294950912  ;;  %v71_v0 = vld [vmem:[#allocation6 + $0x80] sm:$0xff]  ;;  %v72_v1 = vld [vmem:[#allocation6 + $0x88] sm:$0xff]  ;;  %s888_s15 = smov [#allocation8]  }
  0x27   :  { %v103_v2 = vld [vmem:[#allocation6 + $0x180] sm:$0xff]  ;;  %v675_v3 = vpack.c.bf16 %v72_v1, %v71_v0  ;;  %v104_v4 = vld [vmem:[#allocation6 + $0x188] sm:$0xff]  ;;  %v73_v11 = vld [vmem:[#allocation6 + $0x90] sm:$0xff]  ;;  %s523_s16 = sshll.u32 %s888_s15, 4  ;;  %s524_s16 = int_to_ptr.vmem [resolvable:$true] %s523_s16 }
  0x28   :  { %v55_v5 = vld [vmem:[#allocation6] sm:$0xff]  ;;  %v56_v6 = vld [vmem:[#allocation6 + $0x8] sm:$0xff]  ;;  %v707_v7 = vpack.c.bf16 %v104_v4, %v103_v2  ;;  %v74_v13 = vld [vmem:[#allocation6 + $0x98] sm:$0xff]  ;;  %s855_s17 = scalar_lea.vmem %s524_s16, 128  ;;  %p860_p3 = scmp.lt.s32.totalorder %s524_s16, %s524_s16 }
  0x29   :  { %v677_v8 = vpack.c.bf16 %v56_v6, %v55_v5  ;;  %v87_v9 = vld [vmem:[#allocation6 + $0x100] sm:$0xff]  ;;  %v88_v10 = vld [vmem:[#allocation6 + $0x108] sm:$0xff]  ;;  %676 = vmatprep.subr.bf16.mxu0 %v675_v3  ;;  %v105_v14 = vld [vmem:[#allocation6 + $0x190] sm:$0xff]  ;;  %v679_v16 = vpack.c.bf16 %v74_v13, %v73_v11  ;;  %p856_p2 = scmp.ne.s32.totalorder %s524_s16, %s855_s17  ;;  %p861_p4 = scmp.lt.s32.totalorder %s855_s17, %s855_s17 }
  0x2a   :  { %v709_v12 = vpack.c.bf16 %v88_v10, %v87_v9  ;;  %v106_v15 = vld [vmem:[#allocation6 + $0x198] sm:$0xff]  ;;  %708 = vmatprep.subr.bf16.mxu1 %v707_v7  ;;  %v57_v18 = vld [vmem:[#allocation6 + $0x10] sm:$0xff]  ;;  %v75_v23 = vld [vmem:[#allocation6 + $0xa0] sm:$0xff] }
  0x2b   :  { %678 = vmatpush3.bf16.msra.mxu0 %v677_v8  ;;  %v711_v17 = vpack.c.bf16 %v106_v15, %v105_v14  ;;  %v58_v19 = vld [vmem:[#allocation6 + $0x18] sm:$0xff]  ;;  %v89_v20 = vld [vmem:[#allocation6 + $0x110] sm:$0xff]  ;;  %v76_v24 = vld [vmem:[#allocation6 + $0xa8] sm:$0xff]  ;;  %p862_p5 = por %p861_p4, %p860_p3 }
  0x2c   :  { %710 = vmatpush3.bf16.msra.mxu1 %v709_v12  ;;  %v681_v21 = vpack.c.bf16 %v58_v19, %v57_v18  ;;  %v90_v22 = vld [vmem:[#allocation6 + $0x118] sm:$0xff]  ;;  %680 = vmatprep.subr.bf16.mxu0 %v679_v16  ;;  %v683_v26 = vpack.c.bf16 %v76_v24, %v75_v23  ;;  %v107_v27 = vld [vmem:[#allocation6 + $0x1a0] sm:$0xff]  ;;  %v108_v28 = vld [vmem:[#allocation6 + $0x1a8] sm:$0xff] }
  0x2d   :  { %712 = vmatprep.subr.bf16.mxu1 %v711_v17  ;;  %v713_v25 = vpack.c.bf16 %v90_v22, %v89_v20  ;;  %v59_v29 = vld [vmem:[#allocation6 + $0x20] sm:$0xff]  ;;  %v715_v30 = vpack.c.bf16 %v108_v28, %v107_v27  ;;  %v60_v31 = vld [vmem:[#allocation6 + $0x28] sm:$0xff]  ;;  %v77_v35 = vld [vmem:[#allocation6 + $0xb0] sm:$0xff]  ;;  %p863_p6 = pnand %p862_p5, %p856_p2 }
  0x2e   :  { %v91_v32 = vld [vmem:[#allocation6 + $0x120] sm:$0xff]  ;;  %v92_v33 = vld [vmem:[#allocation6 + $0x128] sm:$0xff]  ;;  %v685_v34 = vpack.c.bf16 %v60_v31, %v59_v29  ;;  %v78_v36 = vld [vmem:[#allocation6 + $0xb8] sm:$0xff] }
  0x2f   :  { %682 = vmatpush3.bf16.msra.mxu0 %v681_v21  ;;  %v109_v37 = vld [vmem:[#allocation6 + $0x1b0] sm:$0xff]  ;;  %v717_v38 = vpack.c.bf16 %v92_v33, %v91_v32  ;;  %v687_v39 = vpack.c.bf16 %v78_v36, %v77_v35  ;;  %v110_v40 = vld [vmem:[#allocation6 + $0x1b8] sm:$0xff]  ;;  %v79_v46 = vld [vmem:[#allocation6 + $0xc0] sm:$0xff] }
  0x30   :  { %714 = vmatpush3.bf16.msra.mxu1 %v713_v25  ;;  %684 = vmatprep.subr.bf16.mxu0 %v683_v26  ;;  %v61_v41 = vld [vmem:[#allocation6 + $0x30] sm:$0xff]  ;;  %v62_v42 = vld [vmem:[#allocation6 + $0x38] sm:$0xff]  ;;  %v719_v43 = vpack.c.bf16 %v110_v40, %v109_v37  ;;  %v80_v47 = vld [vmem:[#allocation6 + $0xc8] sm:$0xff] }
  0x31   :  { %716 = vmatprep.subr.bf16.mxu1 %v715_v30  ;;  %v93_v44 = vld [vmem:[#allocation6 + $0x130] sm:$0xff]  ;;  %v94_v45 = vld [vmem:[#allocation6 + $0x138] sm:$0xff]  ;;  %v111_v48 = vld [vmem:[#allocation6 + $0x1c0] sm:$0xff]  ;;  %v689_v50 = vpack.c.bf16 %v62_v42, %v61_v41  ;;  %v691_v52 = vpack.c.bf16 %v80_v47, %v79_v46 }
  0x32   :  { %v112_v49 = vld [vmem:[#allocation6 + $0x1c8] sm:$0xff]  ;;  %v721_v51 = vpack.c.bf16 %v94_v45, %v93_v44  ;;  %v63_v53 = vld [vmem:[#allocation6 + $0x40] sm:$0xff]  ;;  %v81_v58 = vld [vmem:[#allocation6 + $0xd0] sm:$0xff] }
  0x33   :  { %686 = vmatpush3.bf16.msra.mxu0 %v685_v34  ;;  %v64_v54 = vld [vmem:[#allocation6 + $0x48] sm:$0xff]  ;;  %v95_v55 = vld [vmem:[#allocation6 + $0x140] sm:$0xff]  ;;  %v723_v56 = vpack.c.bf16 %v112_v49, %v111_v48  ;;  %v82_v59 = vld [vmem:[#allocation6 + $0xd8] sm:$0xff] }
  0x34   :  { %718 = vmatpush3.bf16.msra.mxu1 %v717_v38  ;;  %688 = vmatprep.subr.bf16.mxu0 %v687_v39  ;;  %v96_v57 = vld [vmem:[#allocation6 + $0x148] sm:$0xff]  ;;  %v113_v60 = vld [vmem:[#allocation6 + $0x1d0] sm:$0xff]  ;;  %v114_v61 = vld [vmem:[#allocation6 + $0x1d8] sm:$0xff]  ;;  %v693_v62 = vpack.c.bf16 %v64_v54, %v63_v53  ;;  %v695_v0 = vpack.c.bf16 %v82_v59, %v81_v58 }
  0x35   :  { %720 = vmatprep.subr.bf16.mxu1 %v719_v43  ;;  %v725_v63 = vpack.c.bf16 %v96_v57, %v95_v55  ;;  %v65_v1 = vld [vmem:[#allocation6 + $0x50] sm:$0xff]  ;;  %v66_v2 = vld [vmem:[#allocation6 + $0x58] sm:$0xff]  ;;  %v727_v4 = vpack.c.bf16 %v114_v61, %v113_v60  ;;  %v83_v6 = vld [vmem:[#allocation6 + $0xe0] sm:$0xff] }
  0x36   :  { %v97_v3 = vld [vmem:[#allocation6 + $0x150] sm:$0xff]  ;;  %v98_v5 = vld [vmem:[#allocation6 + $0x158] sm:$0xff]  ;;  %v84_v7 = vld [vmem:[#allocation6 + $0xe8] sm:$0xff]  ;;  %v697_v10 = vpack.c.bf16 %v66_v2, %v65_v1 }
  0x37   :  { %690 = vmatpush3.bf16.msra.mxu0 %v689_v50  ;;  %v115_v8 = vld [vmem:[#allocation6 + $0x1e0] sm:$0xff]  ;;  %v116_v9 = vld [vmem:[#allocation6 + $0x1e8] sm:$0xff]  ;;  %v729_v13 = vpack.c.bf16 %v98_v5, %v97_v3  ;;  %v699_v14 = vpack.c.bf16 %v84_v7, %v83_v6  ;;  %v49_v17 = vld [vmem:[#allocation3 + $0x18] sm:$0xff] }
  0x38   :  { %722 = vmatpush3.bf16.msra.mxu1 %v721_v51  ;;  %692 = vmatprep.subr.bf16.mxu0 %v691_v52  ;;  %v67_v11 = vld [vmem:[#allocation6 + $0x60] sm:$0xff]  ;;  %v68_v12 = vld [vmem:[#allocation6 + $0x68] sm:$0xff]  ;;  %v731_v18 = vpack.c.bf16 %v116_v9, %v115_v8  ;;  %v85_v20 = vld [vmem:[#allocation6 + $0xf0] sm:$0xff] }
  0x39   :  { %724 = vmatprep.subr.bf16.mxu1 %v723_v56  ;;  %v99_v15 = vld [vmem:[#allocation6 + $0x160] sm:$0xff]  ;;  %v47_v16 = vld [vmem:[#allocation3 + $0x8] sm:$0xff]  ;;  %v86_v21 = vld [vmem:[#allocation6 + $0xf8] sm:$0xff]  ;;  %317 = vmatprep.mubr.f32.mxu1 %v49_v17  ;;  %v701_v24 = vpack.c.bf16 %v68_v12, %v67_v11 }
  0x3a   :  { %v100_v19 = vld [vmem:[#allocation6 + $0x168] sm:$0xff]  ;;  %247 = vmatprep.mubr.f32.mxu0 %v47_v16  ;;  %v117_v22 = vld [vmem:[#allocation6 + $0x1f0] sm:$0xff]  ;;  %v118_v23 = vld [vmem:[#allocation6 + $0x1f8] sm:$0xff]  ;;  %v703_v26 = vpack.c.bf16 %v86_v21, %v85_v20 }
  0x3b   :  { %694 = vmatpush3.bf16.msra.mxu0 %v693_v62  ;;  %v733_v25 = vpack.c.bf16 %v100_v19, %v99_v15  ;;  %v69_v27 = vld [vmem:[#allocation6 + $0x70] sm:$0xff]  ;;  %v70_v28 = vld [vmem:[#allocation6 + $0x78] sm:$0xff]  ;;  %v735_v30 = vpack.c.bf16 %v118_v23, %v117_v22  ;;  %v135_v32 = vld [vmem:[#allocation6 + $0x280] sm:$0xff] }
  0x3c   :  { %726 = vmatpush3.bf16.msra.mxu1 %v725_v63  ;;  %696 = vmatprep.subr.bf16.mxu0 %v695_v0  ;;  %v101_v29 = vld [vmem:[#allocation6 + $0x170] sm:$0xff]  ;;  %v102_v31 = vld [vmem:[#allocation6 + $0x178] sm:$0xff]  ;;  %v136_v33 = vld [vmem:[#allocation6 + $0x288] sm:$0xff]  ;;  %v705_v36 = vpack.c.bf16 %v70_v28, %v69_v27 }
  0x3d   :  { %728 = vmatprep.subr.bf16.mxu1 %v727_v4  ;;  %v167_v34 = vld [vmem:[#allocation6 + $0x380] sm:$0xff]  ;;  %v168_v35 = vld [vmem:[#allocation6 + $0x388] sm:$0xff]  ;;  %v737_v37 = vpack.c.bf16 %v102_v31, %v101_v29  ;;  %v739_v38 = vpack.c.bf16 %v136_v33, %v135_v32  ;;  %v137_v44 = vld [vmem:[#allocation6 + $0x290] sm:$0xff] }
  0x3e   :  { %v119_v39 = vld [vmem:[#allocation6 + $0x200] sm:$0xff]  ;;  %v120_v40 = vld [vmem:[#allocation6 + $0x208] sm:$0xff]  ;;  %v771_v42 = vpack.c.bf16 %v168_v35, %v167_v34  ;;  %v138_v45 = vld [vmem:[#allocation6 + $0x298] sm:$0xff] }
  0x3f   :  { %698 = vmatpush3.bf16.msra.mxu0 %v697_v10  ;;  %v151_v41 = vld [vmem:[#allocation6 + $0x300] sm:$0xff]  ;;  %v152_v43 = vld [vmem:[#allocation6 + $0x308] sm:$0xff]  ;;  %v169_v46 = vld [vmem:[#allocation6 + $0x390] sm:$0xff]  ;;  %v741_v50 = vpack.c.bf16 %v120_v40, %v119_v39  ;;  %v743_v52 = vpack.c.bf16 %v138_v45, %v137_v44 }
  0x40   :  { %730 = vmatpush3.bf16.msra.mxu1 %v729_v13  ;;  %700 = vmatprep.subr.bf16.mxu0 %v699_v14  ;;  %v170_v47 = vld [vmem:[#allocation6 + $0x398] sm:$0xff]  ;;  %v46_v48 = vld [vmem:[#allocation3] sm:$0xff]  ;;  %v48_v49 = vld [vmem:[#allocation3 + $0x10] sm:$0xff]  ;;  %v773_v51 = vpack.c.bf16 %v152_v43, %v151_v41 }
  0x41   :  { %732 = vmatprep.subr.bf16.mxu1 %v731_v18  ;;  %v121_v53 = vld [vmem:[#allocation6 + $0x210] sm:$0xff]  ;;  %v122_v54 = vld [vmem:[#allocation6 + $0x218] sm:$0xff]  ;;  %v775_v56 = vpack.c.bf16 %v170_v47, %v169_v46  ;;  %v139_v58 = vld [vmem:[#allocation6 + $0x2a0] sm:$0xff] }
  0x42   :  { %v153_v55 = vld [vmem:[#allocation6 + $0x310] sm:$0xff]  ;;  %v154_v57 = vld [vmem:[#allocation6 + $0x318] sm:$0xff]  ;;  %v140_v59 = vld [vmem:[#allocation6 + $0x2a8] sm:$0xff]  ;;  %v745_v62 = vpack.c.bf16 %v122_v54, %v121_v53 }
  0x43   :  { %702 = vmatpush3.bf16.msra.mxu0 %v701_v24  ;;  %v171_v60 = vld [vmem:[#allocation6 + $0x3a0] sm:$0xff]  ;;  %v172_v61 = vld [vmem:[#allocation6 + $0x3a8] sm:$0xff]  ;;  %v777_v63 = vpack.c.bf16 %v154_v57, %v153_v55  ;;  %v747_v0 = vpack.c.bf16 %v140_v59, %v139_v58  ;;  %v141_v6 = vld [vmem:[#allocation6 + $0x2b0] sm:$0xff] }
  0x44   :  { %734 = vmatpush3.bf16.msra.mxu1 %v733_v25  ;;  %704 = vmatprep.subr.bf16.mxu0 %v703_v26  ;;  %v123_v1 = vld [vmem:[#allocation6 + $0x220] sm:$0xff]  ;;  %v124_v2 = vld [vmem:[#allocation6 + $0x228] sm:$0xff]  ;;  %v779_v4 = vpack.c.bf16 %v172_v61, %v171_v60  ;;  %v142_v7 = vld [vmem:[#allocation6 + $0x2b8] sm:$0xff] }
  0x45   :  { %736 = vmatprep.subr.bf16.mxu1 %v735_v30  ;;  %v155_v3 = vld [vmem:[#allocation6 + $0x320] sm:$0xff]  ;;  %v156_v5 = vld [vmem:[#allocation6 + $0x328] sm:$0xff]  ;;  %v173_v8 = vld [vmem:[#allocation6 + $0x3b0] sm:$0xff]  ;;  %v749_v10 = vpack.c.bf16 %v124_v2, %v123_v1  ;;  %v751_v12 = vpack.c.bf16 %v142_v7, %v141_v6 }
  0x46   :  { %v174_v9 = vld [vmem:[#allocation6 + $0x3b8] sm:$0xff]  ;;  %v781_v11 = vpack.c.bf16 %v156_v5, %v155_v3  ;;  %v125_v13 = vld [vmem:[#allocation6 + $0x230] sm:$0xff]  ;;  %v143_v18 = vld [vmem:[#allocation6 + $0x2c0] sm:$0xff] }
  0x47   :  { %706 = vmatpush3.bf16.msra.mxu0 %v705_v36  ;;  %v126_v14 = vld [vmem:[#allocation6 + $0x238] sm:$0xff]  ;;  %v157_v15 = vld [vmem:[#allocation6 + $0x330] sm:$0xff]  ;;  %v783_v16 = vpack.c.bf16 %v174_v9, %v173_v8  ;;  %v144_v19 = vld [vmem:[#allocation6 + $0x2c8] sm:$0xff] }
  0x48   :  { %738 = vmatpush3.bf16.msra.mxu1 %v737_v37  ;;  %740 = vmatprep.subr.bf16.mxu0 %v739_v38  ;;  %v158_v17 = vld [vmem:[#allocation6 + $0x338] sm:$0xff]  ;;  %v175_v20 = vld [vmem:[#allocation6 + $0x3c0] sm:$0xff]  ;;  %v176_v21 = vld [vmem:[#allocation6 + $0x3c8] sm:$0xff]  ;;  %v753_v22 = vpack.c.bf16 %v126_v14, %v125_v13  ;;  %v755_v26 = vpack.c.bf16 %v144_v19, %v143_v18 }
  0x49   :  { %772 = vmatprep.subr.bf16.mxu1 %v771_v42  ;;  %v51_v23 = vld [vmem:[#allocation3 + $0x28] sm:$0xff]  ;;  %v53_v24 = vld [vmem:[#allocation3 + $0x38] sm:$0xff]  ;;  %v785_v25 = vpack.c.bf16 %v158_v17, %v157_v15  ;;  %v127_v27 = vld [vmem:[#allocation6 + $0x240] sm:$0xff]  ;;  %v787_v30 = vpack.c.bf16 %v176_v21, %v175_v20  ;;  %v478_v15 = vlaneseq }
  0x4a   :  { %248 = vmatmul.mubr.f32.vlgmr.msra.gmra.mrb[0].mxu0 %v46_v48  ;;  %v128_v28 = vld [vmem:[#allocation6 + $0x248] sm:$0xff]  ;;  %v159_v29 = vld [vmem:[#allocation6 + $0x340] sm:$0xff]  ;;  %v145_v32 = vld [vmem:[#allocation6 + $0x2d0] sm:$0xff] }
  0x4b   :  { %318 = vmatmul.mubr.f32.vlgmr.msra.gmra.mrb[0].mxu1 %v48_v49  ;;  %742 = vmatpush3.bf16.msra.mxu0 %v741_v50  ;;  %v160_v31 = vld [vmem:[#allocation6 + $0x348] sm:$0xff]  ;;  %v146_v33 = vld [vmem:[#allocation6 + $0x2d8] sm:$0xff]  ;;  %v177_v34 = vld [vmem:[#allocation6 + $0x3d0] sm:$0xff]  ;;  %v757_v36 = vpack.c.bf16 %v128_v28, %v127_v27  ;;  %v479_v21 = vshrl.u32 %v478_v15, 7  ;;  %v887_v27 = vmov 0.0  }
  0x4c   :  { %774 = vmatpush3.bf16.msra.mxu1 %v773_v51  ;;  %744 = vmatprep.subr.bf16.mxu0 %v743_v52  ;;  %v178_v35 = vld [vmem:[#allocation6 + $0x3d8] sm:$0xff]  ;;  %v789_v37 = vpack.c.bf16 %v160_v31, %v159_v29  ;;  %v759_v38 = vpack.c.bf16 %v146_v33, %v145_v32  ;;  %v129_v39 = vld [vmem:[#allocation6 + $0x250] sm:$0xff]  ;;  %v147_v44 = vld [vmem:[#allocation6 + $0x2e0] sm:$0xff] }
  0x4d   :  { %776 = vmatprep.subr.bf16.mxu1 %v775_v56  ;;  %387 = vmatprep.mubr.f32.mxu0 %v51_v23  ;;  %v130_v40 = vld [vmem:[#allocation6 + $0x258] sm:$0xff]  ;;  %v161_v41 = vld [vmem:[#allocation6 + $0x350] sm:$0xff]  ;;  %v791_v42 = vpack.c.bf16 %v178_v35, %v177_v34  ;;  %v148_v45 = vld [vmem:[#allocation6 + $0x2e8] sm:$0xff]  ;;  %vm480_vm0 = vcmp.lt.s32.totalorder %v479_v21, 2 }
  0x4e   :  { %457 = vmatprep.mubr.f32.mxu1 %v53_v24  ;;  %v162_v43 = vld [vmem:[#allocation6 + $0x358] sm:$0xff]  ;;  %v179_v46 = vld [vmem:[#allocation6 + $0x3e0] sm:$0xff]  ;;  %v180_v47 = vld [vmem:[#allocation6 + $0x3e8] sm:$0xff]  ;;  %v761_v48 = vpack.c.bf16 %v130_v40, %v129_v39  ;;  %v763_v50 = vpack.c.bf16 %v148_v45, %v147_v44  ;;  %v534_v28 = vsel %vm480_vm0, 1.0, %v887_v27 }
  0x4f   :  { %746 = vmatpush3.bf16.msra.mxu0 %v745_v62  ;;  %v793_v49 = vpack.c.bf16 %v162_v43, %v161_v41  ;;  %v131_v51 = vld [vmem:[#allocation6 + $0x260] sm:$0xff]  ;;  %v132_v52 = vld [vmem:[#allocation6 + $0x268] sm:$0xff]  ;;  %v795_v54 = vpack.c.bf16 %v180_v47, %v179_v46  ;;  %v149_v56 = vld [vmem:[#allocation6 + $0x2f0] sm:$0xff] }
  0x50   :  { %778 = vmatpush3.bf16.msra.mxu1 %v777_v63  ;;  %748 = vmatprep.subr.bf16.mxu0 %v747_v0  ;;  %v163_v53 = vld [vmem:[#allocation6 + $0x360] sm:$0xff]  ;;  %v164_v55 = vld [vmem:[#allocation6 + $0x368] sm:$0xff]  ;;  %v150_v57 = vld [vmem:[#allocation6 + $0x2f8] sm:$0xff]  ;;  %v765_v60 = vpack.c.bf16 %v132_v52, %v131_v51 }
  0x51   :  { %780 = vmatprep.subr.bf16.mxu1 %v779_v4  ;;  %v181_v58 = vld [vmem:[#allocation6 + $0x3f0] sm:$0xff]  ;;  %v182_v59 = vld [vmem:[#allocation6 + $0x3f8] sm:$0xff]  ;;  %v797_v61 = vpack.c.bf16 %v164_v55, %v163_v53  ;;  %v767_v62 = vpack.c.bf16 %v150_v57, %v149_v56  ;;  %v50_v6 = vld [vmem:[#allocation3 + $0x20] sm:$0xff] }
  0x52   :  { %v133_v63 = vld [vmem:[#allocation6 + $0x270] sm:$0xff]  ;;  %v134_v0 = vld [vmem:[#allocation6 + $0x278] sm:$0xff]  ;;  %v799_v1 = vpack.c.bf16 %v182_v59, %v181_v58  ;;  %v533_v24 = vld [vmem:[%s963_s2] ss:$0 sm:$0xff] }
  0x53   :  { %750 = vmatpush3.bf16.msra.mxu0 %v749_v10  ;;  %v165_v2 = vld [vmem:[#allocation6 + $0x370] sm:$0xff]  ;;  %v166_v3 = vld [vmem:[#allocation6 + $0x378] sm:$0xff]  ;;  %v769_v4 = vpack.c.bf16 %v134_v0, %v133_v63  ;;  %v470_v53 = vld [vmem:[%s963_s2 + $0x2] sm:$0x1] }
  0x54   :  { %782 = vmatpush3.bf16.msra.mxu1 %v781_v11  ;;  %752 = vmatprep.subr.bf16.mxu0 %v751_v12  ;;  %v801_v5 = vpack.c.bf16 %v166_v3, %v165_v2  ;;  %v52_v7 = vld [vmem:[#allocation3 + $0x30] sm:$0xff] }
  0x55   :  { %784 = vmatprep.subr.bf16.mxu1 %v783_v16 }
  0x57   :  { %754 = vmatpush3.bf16.msra.mxu0 %v753_v22 }
  0x58   :  { %786 = vmatpush3.bf16.msra.mxu1 %v785_v25  ;;  %756 = vmatprep.subr.bf16.mxu0 %v755_v26 }
  0x59   :  { %788 = vmatprep.subr.bf16.mxu1 %v787_v30 }
  0x5b   :  { %758 = vmatpush3.bf16.msra.mxu0 %v757_v36 }
  0x5c   :  { %790 = vmatpush3.bf16.msra.mxu1 %v789_v37  ;;  %760 = vmatprep.subr.bf16.mxu0 %v759_v38 }
  0x5d   :  { %792 = vmatprep.subr.bf16.mxu1 %v791_v42 }
  0x5f   :  { %762 = vmatpush3.bf16.msra.mxu0 %v761_v48 }
  0x60   :  { %794 = vmatpush3.bf16.msra.mxu1 %v793_v49  ;;  %764 = vmatprep.subr.bf16.mxu0 %v763_v50  ;;  %v469_v49 = vld [vmem:[%s963_s2 + $0x1] sm:$0x1]  ;;  %v508_v50 = vsub.s32 0, %v479_v21 }
  0x61   :  { %796 = vmatprep.subr.bf16.mxu1 %v795_v54 }
  0x63   :  { %766 = vmatpush3.bf16.msra.mxu0 %v765_v60 }
  0x64   :  { %798 = vmatpush3.bf16.msra.mxu1 %v797_v61  ;;  %768 = vmatprep.subr.bf16.mxu0 %v767_v62 }
  0x65   :  { %800 = vmatprep.subr.bf16.mxu1 %v799_v1 }
  0x67   :  { %770 = vmatpush3.bf16.msra.mxu0 %v769_v4 }
  0x68   :  { %802 = vmatpush3.bf16.msra.mxu1 %v801_v5 }
  0x6a   :  { %388 = vmatmul.mubr.f32.vlgmr.msra.gmra.mrb[2].mxu0 %v50_v6 }
  0x6b   :  { %458 = vmatmul.mubr.f32.vlgmr.msra.gmra.mrb[2].mxu1 %v52_v7 }
 0x11d   :  { %v567_v8 = vpop.f32.mrb[0].mxu0 }
 0x11e   :  { %v602_v9 = vpop.f32.mrb[0].mxu1  ;;  %v568_v10 = vpop.f32.mrb[1].mxu0 }
 0x11f   :  { %v569_v11 = vadd.f32 %v568_v10, %v567_v8  ;;  %v603_v12 = vpop.f32.mrb[1].mxu1 }
 0x120   :  { %v604_v13 = vadd.f32 %v603_v12, %v602_v9 }
 0x122   :  { %v320_v14 = vadd.f32 %v604_v13, %v569_v11 }
 0x13d   :  { %v637_v16 = vpop.f32.mrb[2].mxu0 }
 0x13e   :  { %v638_v17 = vpop.f32.mrb[3].mxu0  ;;  %v672_v18 = vpop.f32.mrb[2].mxu1 }
 0x13f   :  { %v639_v19 = vadd.f32 %v638_v17, %v637_v16  ;;  %v673_v20 = vpop.f32.mrb[3].mxu1 }
 0x140   :  { %v674_v22 = vadd.f32 %v673_v20, %v672_v18 }
 0x141   :  { %v390_v23 = vadd.f32 %v639_v19, %v320_v14 }
 0x143   :  { %v460_v25 = vadd.f32 %v674_v22, %v390_v23 }
 0x145   :  { %v476_v26 = vadd.f32 %v533_v24, %v460_v25 }
 0x147   :  { %v477_v29 = vmax.f32 %v476_v26, 0.0 }
 0x149   :  { %v483_v30 = vmul.f32 %v534_v28, %v477_v29 }
 0x14b   :  { %v484_v31 = vrot.slane %v483_v30, 4 }
 0x14d   :  { %v485_v32 = vadd.f32 %v484_v31, %v483_v30 }
 0x14f   :  { %v486_v33 = vrot.slane %v485_v32, 2 }
 0x151   :  { %v487_v34 = vadd.f32 %v486_v33, %v485_v32 }
 0x153   :  { %v488_v35 = vrot.slane %v487_v34, 1 }
 0x155   :  { %v489_v36 = vadd.f32 %v488_v35, %v487_v34 }
 0x157   :  { %v490_v37 = vmul.f32 0.5, %v489_v36 }
 0x159   :  { %v491_v38 = vsub.f32 %v477_v29, %v490_v37 }
 0x15b   :  { %v492_v39 = vmul.f32 %v534_v28, %v491_v38 }
 0x15d   :  { %v493_v40 = vmul.f32 %v492_v39, %v492_v39 }
 0x15f   :  { %v494_v41 = vrot.slane %v493_v40, 4 }
 0x161   :  { %v495_v42 = vadd.f32 %v494_v41, %v493_v40 }
 0x163   :  { %v496_v43 = vrot.slane %v495_v42, 2 }
 0x165   :  { %v497_v44 = vadd.f32 %v496_v43, %v495_v42 }
 0x167   :  { %v498_v45 = vrot.slane %v497_v44, 1 }
 0x169   :  { %v499_v46 = vadd.f32 %v498_v45, %v497_v44 }
 0x16b   :  { %v500_v47 = vmul.f32 0.5, %v499_v46 }
 0x16d   :  { %v501_v48 = vadd.f32 1e-05, %v500_v47 }
 0x16f   :  { %809 = vrsqrt.f32 %v501_v48 }
 0x179   :  { %v810_v51 = vpop.eup %809 }
 0x17a   :  { %v503_v52 = vmul.f32 %v810_v51, %v469_v49 }
 0x17c   :  { %v504_v54 = vmul.f32 %v503_v52, %v490_v37  ;;  %v509_v55 = vrot.slane %v503_v52, %v508_v50 }
 0x17e   :  { %v505_v56 = vsub.f32 %v470_v53, %v504_v54  ;;  %v510_v57 = vmul.f32 %v509_v55, %v477_v29 }
 0x180   :  { %v514_v58 = vrot.slane %v505_v56, %v508_v50 }
 0x182   :  { %v515_v59 = vadd.f32 %v514_v58, %v510_v57 }
 0x184   :  { %516 = vst [vmem:[#allocation8] sm:$0xff] %v515_v59 }
 0x185   :  { %866 = shalt.err (!%p863_p6)
}
 0x186   :  { %s867_s2 = scalar_lea.hbm %s964_s3, 128 }
 0x187   :  { %p868_p7 = scmp.ne.s32.totalorder %s964_s3, %s867_s2  ;;  %p871_p8 = scmp.lt.u32.totalorder %s867_s2, %s964_s3 }
 0x189   :  { %p873_p9 = pnand %p871_p8, %p868_p7 }
 0x18b   :  { %876 = shalt.err (!%p873_p9)
}
 0x18c   :  { %526 = dma.vmem_to_hbm [thread:$0]  %s524_s16, 128, %s964_s3, [#allocation5]  }
 0x18d   :  { %881 = dma.done.wait [#allocation5], 128  }
 0x18e   :  { %882 = vsyncadd [#allocation5], 4294967168 }
 0x18f   :  { %530 = vsyncpa [#allocation4], 1 }
 0x190   :  { %531 = vsyncpa [#allocation7], 1 }
 0x191   :  { %532 = vsyncpa [#allocation5], 1 }

</bundles_post_ra>
